<compile_context>
chip_gen: v7x
topology: tpu7x:2x2x1
jax: 0.10.0
libtpu: 0.0.40
codegen_flags: <defaults>
</compile_context>

<pallas_src>
import jax
import jax.numpy as jnp
from jax.experimental import pallas as pl
from jax.experimental.pallas import tpu as pltpu

_LANE = 128
_SUBLANE = 8


def _round_up(n, m):
    return ((n + m - 1) // m) * m


def _backbone_classifier_kernel(x_ref, wbt_ref, bb_ref, wct_ref, bc_ref,
                                out_ref, feat_acc):
    """Two chained matmuls; the [tm, E] feature intermediate stays on-chip.

    x_ref   : [tm, tk]  bf16 flattened input block   (grid: batch i, K-step k)
    wbt_ref : [tk, E]   bf16 backbone weight slice   (Wb.T, K-tiled)
    bb_ref  : [1,  E]   f32  backbone bias
    wct_ref : [E,  Cp]  bf16 classifier weight       (Wc.T, lane-padded)
    bc_ref  : [1,  Cp]  f32  classifier bias         (lane-padded)
    out_ref : [tm, Cp]  f32  padded logits
    feat_acc: [tm, E]   f32  VMEM scratch, feature accumulator over K axis
    """
    k = pl.program_id(1)

    @pl.when(k == 0)
    def _():
        feat_acc[...] = jnp.zeros_like(feat_acc)

    # backbone: partial x @ Wb.T, accumulated in f32 across the Din (K) axis
    feat_acc[...] += jnp.dot(x_ref[...], wbt_ref[...],
                             preferred_element_type=jnp.float32)

    @pl.when(k == pl.num_programs(1) - 1)
    def _():
        feats = feat_acc[...] + bb_ref[...]
        # TODO(synk): the real injected backbone may end in a nonlinearity;
        # it would be applied to `feats` here, on-chip, before the classifier.
        logits = jnp.dot(feats.astype(wct_ref.dtype), wct_ref[...],
                         preferred_element_type=jnp.float32) + bc_ref[...]
        out_ref[...] = logits.astype(out_ref.dtype)


def prepare_params(wb, bb, wc, bc, *, param_dtype=jnp.bfloat16):
    """One-time parameter prep (analogue of update_fc): transpose, lane-pad,
    cast to bf16.  Nothing here runs on the forward path.

      backbone  : f = x @ wb.T + bb      wb: [E, Din], bb: [E]
      classifier: y = f @ wc.T + bc      wc: [C, E],   bc: [C]
    """
    embed_dim = wb.shape[0]
    num_classes = wc.shape[0]
    cp = _round_up(num_classes, _LANE)          # lane-dense output width

    wbt = wb.T.astype(param_dtype)                                    # [Din, E]
    bb2 = bb.reshape(1, embed_dim).astype(jnp.float32)                # [1,  E]
    wct = jnp.pad(wc.T, ((0, 0), (0, cp - num_classes))).astype(param_dtype)  # [E, Cp]
    bc2 = jnp.pad(bc, (0, cp - num_classes)).reshape(1, cp).astype(jnp.float32)
    return wbt, bb2, wct, bc2, num_classes


def model_forward(x_nchw, wbt, bb2, wct, bc2, num_classes,
                  *, tm_max=256, tk_max=2048):
    """x_nchw: [B, C, H, W].  Returns logits [B, num_classes] (f32)."""
    B = x_nchw.shape[0]
    x_flat = x_nchw.reshape(B, -1)              # torch.flatten(x, 1)
    din = x_flat.shape[1]
    embed_dim = wbt.shape[1]
    cp = wct.shape[1]

    # --- batch tiling: cdiv, never a single giant block --------------------
    tm = min(tm_max, _round_up(B, _SUBLANE))
    nb = pl.cdiv(B, tm)
    b_pad = nb * tm

    # --- Din (K) tiling: single step if small, 2048-wide slices otherwise --
    if din <= tk_max:
        tk, din_pad = din, din
    else:
        tk = tk_max                             # multiple of 128
        din_pad = _round_up(din, tk)
    nk = din_pad // tk

    # cast activations to bf16 (halves DMA bytes); zero-pad to tile multiples
    x_in = x_flat.astype(wbt.dtype)
    if b_pad != B or din_pad != din:
        x_in = jnp.pad(x_in, ((0, b_pad - B), (0, din_pad - din)))
    wbt_in = wbt if din_pad == din else jnp.pad(wbt, ((0, din_pad - din), (0, 0)))

    itemsize = jnp.dtype(wbt.dtype).itemsize
    vmem_est = (2 * (tm * tk + tk * embed_dim + embed_dim * cp) * itemsize
                + 2 * (embed_dim + cp) * 4
                + 2 * tm * cp * 4
                + tm * embed_dim * 4)
    vmem_limit = max(32 * 1024 * 1024, int(1.5 * vmem_est))

    logits_padded = pl.pallas_call(
        _backbone_classifier_kernel,
        out_shape=jax.ShapeDtypeStruct((b_pad, cp), jnp.float32),
        grid_spec=pltpu.PrefetchScalarGridSpec(
            num_scalar_prefetch=0,
            grid=(nb, nk),
            in_specs=[
                pl.BlockSpec((tm, tk), lambda i, k: (i, k)),          # x
                pl.BlockSpec((tk, embed_dim), lambda i, k: (k, 0)),   # Wb.T slice
                pl.BlockSpec((1, embed_dim), lambda i, k: (0, 0)),    # bb
                pl.BlockSpec((embed_dim, cp), lambda i, k: (0, 0)),   # Wc.T
                pl.BlockSpec((1, cp), lambda i, k: (0, 0)),           # bc
            ],
            out_specs=pl.BlockSpec((tm, cp), lambda i, k: (i, 0)),
            scratch_shapes=[pltpu.VMEM((tm, embed_dim), jnp.float32)],
        ),
        compiler_params=pltpu.CompilerParams(
            dimension_semantics=("parallel", "arbitrary"),
            vmem_limit_bytes=vmem_limit,
        ),
    )(x_in, wbt_in, bb2, wct, bc2)

    # drop batch padding + lane padding
    return logits_padded[:B, :num_classes]


def _kaiming_uniform_linear(key, out_features, in_features):
    # nn.init.kaiming_uniform_(w, nonlinearity='linear'): gain=1,
    # bound = gain * sqrt(3 / fan_in)
    bound = (3.0 / in_features) ** 0.5
    return jax.random.uniform(
        key, (out_features, in_features), jnp.float32, -bound, bound
    )


if __name__ == "__main__":
    # small shapes implied by the module:
    #   batch=2, channels=4, spatial=16x16, embd_dim=32, init_cls_num=10
    B, C, H, W = 2, 4, 16, 16
    embd_dim = 32
    init_cls_num = 10
    in_dim = C * H * W

    key = jax.random.PRNGKey(0)
    k_x, k_wb, k_bb, k_wc = jax.random.split(key, 4)

    x = jax.random.normal(k_x, (B, C, H, W), jnp.float32)

    # synthetic deterministic backbone params (flatten + Linear -> embd_dim)
    # TODO(synk): the real backbone is an injected module in the PyTorch code;
    # a flatten+Linear stand-in is used here, with the hook point for a
    # nonlinearity marked inside the kernel.
    wb = _kaiming_uniform_linear(k_wb, embd_dim, in_dim)
    bb = jax.random.uniform(k_bb, (embd_dim,), jnp.float32, -0.01, 0.01)

    # classifier after update_fc() for task 0:
    #   kaiming_uniform_(weight, nonlinearity='linear'), bias = 0
    wc = _kaiming_uniform_linear(k_wc, init_cls_num, embd_dim)
    bc = jnp.zeros((init_cls_num,), jnp.float32)

    # one-time parameter preparation (transpose + lane padding + bf16 cast)
    wbt, bb2, wct, bc2, num_classes = prepare_params(wb, bb, wc, bc)

    logits = model_forward(x, wbt, bb2, wct, bc2, num_classes)
    logits = jax.block_until_ready(logits)

    # reference check in plain JAX (same math as the PyTorch module: two
    # separate f32 linear layers at highest precision); tolerance loosened
    # for the bf16 weight/activation streaming (f32 accumulation).
    feats_ref = jnp.matmul(x.reshape(B, -1), wb.T, precision="highest") + bb
    logits_ref = jnp.matmul(feats_ref, wc.T, precision="highest") + bc
    assert logits.shape == (B, init_cls_num)
    assert jnp.allclose(logits, logits_ref, atol=5e-2, rtol=5e-2)

    print("KERNEL_OK")
</pallas_src>

<mosaic_0001>
module attributes {stable_mosaic.version = 11 : i64} {
  func.func @_backbone_classifier_kernel(%arg0: i32, %arg1: i32, %arg2: memref<8x1024xbf16, #tpu.memory_space<vmem>>, %arg3: memref<1024x32xbf16, #tpu.memory_space<vmem>>, %arg4: memref<1x32xf32, #tpu.memory_space<vmem>>, %arg5: memref<32x128xbf16, #tpu.memory_space<vmem>>, %arg6: memref<1x128xf32, #tpu.memory_space<vmem>>, %arg7: memref<8x128xf32, #tpu.memory_space<vmem>>, %arg8: memref<8x32xf32, #tpu.memory_space<vmem>>) attributes {dimension_semantics = [#tpu.dimension_semantics<parallel>, #tpu.dimension_semantics<arbitrary>], iteration_bounds = array<i64: 1, 1>, scalar_prefetch = 0 : i64, scratch_operands = 1 : i64, tpu.core_type = #tpu.core_type<tc>, window_params = [{transform_indices = @transform_0, window_bounds = array<i64: 8, 1024>}, {transform_indices = @transform_1, window_bounds = array<i64: 1024, 32>}, {pipeline_mode = #tpu.pipeline_mode<synchronous>, transform_indices = @transform_2, window_bounds = array<i64: 1, 32>}, {pipeline_mode = #tpu.pipeline_mode<synchronous>, transform_indices = @transform_3, window_bounds = array<i64: 32, 128>}, {pipeline_mode = #tpu.pipeline_mode<synchronous>, transform_indices = @transform_4, window_bounds = array<i64: 1, 128>}, {transform_indices = @transform_5, window_bounds = array<i64: 8, 128>}]} {
    %c0_i32 = arith.constant 0 : i32
    %0 = arith.cmpi eq, %arg1, %c0_i32 : i32
    %1 = arith.extui %0 : i1 to i32
    %c0_i32_0 = arith.constant 0 : i32
    %2 = arith.cmpi ne, %1, %c0_i32_0 : i32
    scf.if %2 {
      %cst_10 = arith.constant 0.000000e+00 : f32
      %12 = vector.broadcast %cst_10 : f32 to vector<8x32xf32>
      %c0_11 = arith.constant 0 : index
      %c0_12 = arith.constant 0 : index
      %13 = vector.load %arg8[%c0_11, %c0_12] : memref<8x32xf32, #tpu.memory_space<vmem>>, vector<8x32xf32>
      tpu.vector_store %arg8[%c0_11, %c0_12], %12 {strides = array<i32>} : memref<8x32xf32, #tpu.memory_space<vmem>>, vector<8x32xf32>,
    } else {
    }
    %c0 = arith.constant 0 : index
    %c0_1 = arith.constant 0 : index
    %3 = vector.load %arg8[%c0, %c0_1] : memref<8x32xf32, #tpu.memory_space<vmem>>, vector<8x32xf32>
    %c0_2 = arith.constant 0 : index
    %c0_3 = arith.constant 0 : index
    %4 = vector.load %arg2[%c0_2, %c0_3] : memref<8x1024xbf16, #tpu.memory_space<vmem>>, vector<8x1024xbf16>
    %c0_4 = arith.constant 0 : index
    %c0_5 = arith.constant 0 : index
    %5 = vector.load %arg3[%c0_4, %c0_5] : memref<1024x32xbf16, #tpu.memory_space<vmem>>, vector<1024x32xbf16>
    %cst = arith.constant dense<0.000000e+00> : vector<8x32xf32>
    %6 = tpu.matmul %4, %5, %cst {dimension_numbers = #tpu.dot_dimension_numbers<[1], [0], [0], [1], [0, 0, 1, 1], [], []>} : vector<8x1024xbf16>, vector<1024x32xbf16>, vector<8x32xf32> -> vector<8x32xf32>
    %7 = arith.addf %3, %6 : vector<8x32xf32>
    %c0_6 = arith.constant 0 : index
    %c0_7 = arith.constant 0 : index
    %8 = vector.load %arg8[%c0_6, %c0_7] : memref<8x32xf32, #tpu.memory_space<vmem>>, vector<8x32xf32>
    tpu.vector_store %arg8[%c0_6, %c0_7], %7 {strides = array<i32>} : memref<8x32xf32, #tpu.memory_space<vmem>>, vector<8x32xf32>,
    %c0_i32_8 = arith.constant 0 : i32
    %9 = arith.cmpi eq, %arg1, %c0_i32_8 : i32
    %10 = arith.extui %9 : i1 to i32
    %c0_i32_9 = arith.constant 0 : i32
    %11 = arith.cmpi ne, %10, %c0_i32_9 : i32
    scf.if %11 {
      %c0_10 = arith.constant 0 : index
      %c0_11 = arith.constant 0 : index
      %12 = vector.load %arg8[%c0_10, %c0_11] : memref<8x32xf32, #tpu.memory_space<vmem>>, vector<8x32xf32>
      %c0_12 = arith.constant 0 : index
      %c0_13 = arith.constant 0 : index
      %13 = vector.load %arg4[%c0_12, %c0_13] : memref<1x32xf32, #tpu.memory_space<vmem>>, vector<1x32xf32>
      %14 = vector.broadcast %13 : vector<1x32xf32> to vector<8x32xf32>
      %15 = arith.addf %12, %14 : vector<8x32xf32>
      %16 = arith.truncf %15 : vector<8x32xf32> to vector<8x32xbf16>
      %c0_14 = arith.constant 0 : index
      %c0_15 = arith.constant 0 : index
      %17 = vector.load %arg5[%c0_14, %c0_15] : memref<32x128xbf16, #tpu.memory_space<vmem>>, vector<32x128xbf16>
      %cst_16 = arith.constant dense<0.000000e+00> : vector<8x128xf32>
      %18 = tpu.matmul %16, %17, %cst_16 {dimension_numbers = #tpu.dot_dimension_numbers<[1], [0], [0], [1], [0, 0, 1, 1], [], []>} : vector<8x32xbf16>, vector<32x128xbf16>, vector<8x128xf32> -> vector<8x128xf32>
      %c0_17 = arith.constant 0 : index
      %c0_18 = arith.constant 0 : index
      %19 = vector.load %arg6[%c0_17, %c0_18] : memref<1x128xf32, #tpu.memory_space<vmem>>, vector<1x128xf32>
      %20 = vector.broadcast %19 : vector<1x128xf32> to vector<8x128xf32>
      %21 = arith.addf %18, %20 : vector<8x128xf32>
      %c0_19 = arith.constant 0 : index
      %c0_20 = arith.constant 0 : index
      %22 = vector.load %arg7[%c0_19, %c0_20] : memref<8x128xf32, #tpu.memory_space<vmem>>, vector<8x128xf32>
      tpu.vector_store %arg7[%c0_19, %c0_20], %21 {strides = array<i32>} : memref<8x128xf32, #tpu.memory_space<vmem>>, vector<8x128xf32>,
    } else {
    }
    return
  }
  func.func @transform_0(%arg0: i32, %arg1: i32) -> (i32, i32) {
    %c0_i32 = arith.constant 0 : i32
    return %arg0, %arg1 : i32, i32
  }
  func.func @transform_1(%arg0: i32, %arg1: i32) -> (i32, i32) {
    %c0_i32 = arith.constant 0 : i32
    %c0_i32_0 = arith.constant 0 : i32
    return %arg1, %c0_i32 : i32, i32
  }
  func.func @transform_2(%arg0: i32, %arg1: i32) -> (i32, i32) {
    %c0_i32 = arith.constant 0 : i32
    %c0_i32_0 = arith.constant 0 : i32
    %c0_i32_1 = arith.constant 0 : i32
    return %c0_i32, %c0_i32_0 : i32, i32
  }
  func.func @transform_3(%arg0: i32, %arg1: i32) -> (i32, i32) {
    %c0_i32 = arith.constant 0 : i32
    %c0_i32_0 = arith.constant 0 : i32
    %c0_i32_1 = arith.constant 0 : i32
    return %c0_i32, %c0_i32_0 : i32, i32
  }
  func.func @transform_4(%arg0: i32, %arg1: i32) -> (i32, i32) {
    %c0_i32 = arith.constant 0 : i32
    %c0_i32_0 = arith.constant 0 : i32
    %c0_i32_1 = arith.constant 0 : i32
    return %c0_i32, %c0_i32_0 : i32, i32
  }
  func.func @transform_5(%arg0: i32, %arg1: i32) -> (i32, i32) {
    %c0_i32 = arith.constant 0 : i32
    %c0_i32_0 = arith.constant 0 : i32
    return %arg0, %c0_i32 : i32, i32
  }
}

</mosaic_0001>

<bundles_post_ra>
// kernel: tpu_custom_call.1
= control target key start
LH: loop header
LB: loop body
LE: loop exit
PB: predicated region body
PF: predicated region fallthrough
CT: control target
= control target key end

     0   :  { %s1371_s0 = inlined_call_operand.vmem [shape: bf16[8,1024], index: 0, kind: input, shape index: {}]   ;;  %s1372_s1 = inlined_call_operand.vmem [shape: bf16[1024,32], index: 1, kind: input, shape index: {}]   ;;  %s1373_s2 = inlined_call_operand.vmem [shape: f32[1,32], index: 2, kind: input, shape index: {}]   ;;  %s1374_s3 = inlined_call_operand.vmem [shape: bf16[32,128], index: 3, kind: input, shape index: {}]   ;;  %s1375_s4 = inlined_call_operand.vmem [shape: f32[1,128], index: 4, kind: input, shape index: {}]   ;;  %s1376_s5 = inlined_call_operand.hbm [shape: f32[8,128], index: 5, kind: output, shape index: {}]  }
   0x1   :  { %v1009_v0 = vld [vmem:[%s1372_s1 + $0x40] sm:$0xff]   ;;  %v1013_v4 = vld [vmem:[%s1372_s1 + $0x48] sm:$0xff]   ;;  %v1017_v8 = vld [vmem:[%s1372_s1 + $0x50] sm:$0xff]  }
   0x2   :  { %v1010_v1 = vld [vmem:[%s1372_s1 + $0xc0] sm:$0xff]   ;;  %907 = vmatprep.subr.bf16.mxu0 %v1009_v0  ;;  %v1014_v5 = vld [vmem:[%s1372_s1 + $0xc8] sm:$0xff]   ;;  %v1018_v9 = vld [vmem:[%s1372_s1 + $0xd0] sm:$0xff]  }
   0x3   :  { %v1011_v2 = vld [vmem:[%s1372_s1] sm:$0xff]   ;;  %929 = vmatprep.subr.bf16.mxu1 %v1010_v1  ;;  %v1015_v6 = vld [vmem:[%s1372_s1 + $0x8] sm:$0xff]   ;;  %v1019_v10 = vld [vmem:[%s1372_s1 + $0x10] sm:$0xff]  }
   0x4   :  { %v1012_v3 = vld [vmem:[%s1372_s1 + $0x80] sm:$0xff]   ;;  %908 = vmatpush3.bf16.msra.mxu0 %v1011_v2  ;;  %v1016_v7 = vld [vmem:[%s1372_s1 + $0x88] sm:$0xff]   ;;  %v1020_v11 = vld [vmem:[%s1372_s1 + $0x90] sm:$0xff]  }
   0x5   :  { %930 = vmatpush3.bf16.msra.mxu1 %v1012_v3  ;;  %909 = vmatprep.subr.bf16.mxu0 %v1013_v4  ;;  %v1021_v12 = vld [vmem:[%s1372_s1 + $0x58] sm:$0xff]   ;;  %v1025_v16 = vld [vmem:[%s1372_s1 + $0x60] sm:$0xff]   ;;  %v1029_v20 = vld [vmem:[%s1372_s1 + $0x68] sm:$0xff]  }
   0x6   :  { %931 = vmatprep.subr.bf16.mxu1 %v1014_v5  ;;  %v1022_v13 = vld [vmem:[%s1372_s1 + $0xd8] sm:$0xff]   ;;  %v1026_v17 = vld [vmem:[%s1372_s1 + $0xe0] sm:$0xff]   ;;  %v1030_v21 = vld [vmem:[%s1372_s1 + $0xe8] sm:$0xff]  }
   0x7   :  { %v1023_v14 = vld [vmem:[%s1372_s1 + $0x18] sm:$0xff]   ;;  %v1027_v18 = vld [vmem:[%s1372_s1 + $0x20] sm:$0xff]   ;;  %v1031_v22 = vld [vmem:[%s1372_s1 + $0x28] sm:$0xff]  }
   0x8   :  { %910 = vmatpush3.bf16.msra.mxu0 %v1015_v6  ;;  %v1024_v15 = vld [vmem:[%s1372_s1 + $0x98] sm:$0xff]   ;;  %v1028_v19 = vld [vmem:[%s1372_s1 + $0xa0] sm:$0xff]   ;;  %v1032_v23 = vld [vmem:[%s1372_s1 + $0xa8] sm:$0xff]  }
   0x9   :  { %932 = vmatpush3.bf16.msra.mxu1 %v1016_v7  ;;  %911 = vmatprep.subr.bf16.mxu0 %v1017_v8  ;;  %v1033_v24 = vld [vmem:[%s1372_s1 + $0x70] sm:$0xff]   ;;  %v1037_v28 = vld [vmem:[%s1372_s1 + $0x78] sm:$0xff]   ;;  %v29_v32 = vld [vmem:[%s1371_s0] sm:$0xff] }
   0xa   :  { %933 = vmatprep.subr.bf16.mxu1 %v1018_v9  ;;  %v1034_v25 = vld [vmem:[%s1372_s1 + $0xf0] sm:$0xff]   ;;  %v1038_v29 = vld [vmem:[%s1372_s1 + $0xf8] sm:$0xff]   ;;  %v30_v33 = vld [vmem:[%s1371_s0 + $0x8] sm:$0xff]  ;;  %v830_v34 = vcombine.low %v29_v32, %v29_v32  ;;  %v831_v35 = vcombine.high %v29_v32, %v29_v32 }
   0xb   :  { %v1035_v26 = vld [vmem:[%s1372_s1 + $0x30] sm:$0xff]   ;;  %v1039_v30 = vld [vmem:[%s1372_s1 + $0x38] sm:$0xff]   ;;  %v832_v36 = vcombine.low %v30_v33, %v30_v33  ;;  %v833_v37 = vcombine.high %v30_v33, %v30_v33  ;;  %v1045_v38 = vld [vmem:[%s1372_s1 + $0x140] sm:$0xff]  }
   0xc   :  { %912 = vmatpush3.bf16.msra.mxu0 %v1019_v10  ;;  %v1036_v27 = vld [vmem:[%s1372_s1 + $0xb0] sm:$0xff]   ;;  %v1040_v31 = vld [vmem:[%s1372_s1 + $0xb8] sm:$0xff]   ;;  %v1046_v39 = vld [vmem:[%s1372_s1 + $0x1c0] sm:$0xff]   ;;  %605 = vmatprep.mubr.bf16.mxu0 %v831_v35 }
   0xd   :  { %934 = vmatpush3.bf16.msra.mxu1 %v1020_v11  ;;  %913 = vmatprep.subr.bf16.mxu0 %v1021_v12  ;;  %v1047_v40 = vld [vmem:[%s1372_s1 + $0x100] sm:$0xff]   ;;  %v1049_v42 = vld [vmem:[%s1372_s1 + $0x148] sm:$0xff]   ;;  %v1053_v46 = vld [vmem:[%s1372_s1 + $0x150] sm:$0xff]  }
   0xe   :  { %935 = vmatprep.subr.bf16.mxu1 %v1022_v13  ;;  %645 = vmatprep.mubr.bf16.mxu1 %v833_v37  ;;  %v1048_v41 = vld [vmem:[%s1372_s1 + $0x180] sm:$0xff]   ;;  %v1050_v43 = vld [vmem:[%s1372_s1 + $0x1c8] sm:$0xff]   ;;  %v1054_v47 = vld [vmem:[%s1372_s1 + $0x1d0] sm:$0xff]  }
   0xf   :  { %v1051_v44 = vld [vmem:[%s1372_s1 + $0x108] sm:$0xff]   ;;  %v1055_v48 = vld [vmem:[%s1372_s1 + $0x110] sm:$0xff]   ;;  %v1057_v50 = vld [vmem:[%s1372_s1 + $0x158] sm:$0xff]  }
  0x10   :  { %914 = vmatpush3.bf16.msra.mxu0 %v1023_v14  ;;  %v1052_v45 = vld [vmem:[%s1372_s1 + $0x188] sm:$0xff]   ;;  %v1056_v49 = vld [vmem:[%s1372_s1 + $0x190] sm:$0xff]   ;;  %v1058_v51 = vld [vmem:[%s1372_s1 + $0x1d8] sm:$0xff]  }
  0x11   :  { %936 = vmatpush3.bf16.msra.mxu1 %v1024_v15  ;;  %915 = vmatprep.subr.bf16.mxu0 %v1025_v16  ;;  %v1059_v52 = vld [vmem:[%s1372_s1 + $0x118] sm:$0xff]   ;;  %v1061_v54 = vld [vmem:[%s1372_s1 + $0x160] sm:$0xff]   ;;  %v1065_v58 = vld [vmem:[%s1372_s1 + $0x168] sm:$0xff]  }
  0x12   :  { %937 = vmatprep.subr.bf16.mxu1 %v1026_v17  ;;  %v1060_v53 = vld [vmem:[%s1372_s1 + $0x198] sm:$0xff]   ;;  %v1062_v55 = vld [vmem:[%s1372_s1 + $0x1e0] sm:$0xff]   ;;  %v1066_v59 = vld [vmem:[%s1372_s1 + $0x1e8] sm:$0xff]  }
  0x13   :  { %v1063_v56 = vld [vmem:[%s1372_s1 + $0x120] sm:$0xff]   ;;  %v1067_v60 = vld [vmem:[%s1372_s1 + $0x128] sm:$0xff]   ;;  %v1069_v62 = vld [vmem:[%s1372_s1 + $0x170] sm:$0xff]  }
  0x14   :  { %916 = vmatpush3.bf16.msra.mxu0 %v1027_v18  ;;  %v1064_v57 = vld [vmem:[%s1372_s1 + $0x1a0] sm:$0xff]   ;;  %v1068_v61 = vld [vmem:[%s1372_s1 + $0x1a8] sm:$0xff]   ;;  %v1070_v63 = vld [vmem:[%s1372_s1 + $0x1f0] sm:$0xff]  }
  0x15   :  { %938 = vmatpush3.bf16.msra.mxu1 %v1028_v19  ;;  %917 = vmatprep.subr.bf16.mxu0 %v1029_v20  ;;  %v1071_v0 = vld [vmem:[%s1372_s1 + $0x130] sm:$0xff]   ;;  %v1073_v2 = vld [vmem:[%s1372_s1 + $0x178] sm:$0xff]  }
  0x16   :  { %939 = vmatprep.subr.bf16.mxu1 %v1030_v21  ;;  %v1072_v1 = vld [vmem:[%s1372_s1 + $0x1b0] sm:$0xff]   ;;  %v1074_v3 = vld [vmem:[%s1372_s1 + $0x1f8] sm:$0xff]  }
  0x17   :  { %v1075_v4 = vld [vmem:[%s1372_s1 + $0x138] sm:$0xff]   ;;  %v31_v6 = vld [vmem:[%s1371_s0 + $0x10] sm:$0xff] }
  0x18   :  { %918 = vmatpush3.bf16.msra.mxu0 %v1031_v22  ;;  %v1076_v5 = vld [vmem:[%s1372_s1 + $0x1b8] sm:$0xff]   ;;  %v834_v7 = vcombine.low %v31_v6, %v31_v6  ;;  %v835_v8 = vcombine.high %v31_v6, %v31_v6 }
  0x19   :  { %940 = vmatpush3.bf16.msra.mxu1 %v1032_v23  ;;  %919 = vmatprep.subr.bf16.mxu0 %v1033_v24  ;;  %v32_v9 = vld [vmem:[%s1371_s0 + $0x18] sm:$0xff] }
  0x1a   :  { %941 = vmatprep.subr.bf16.mxu1 %v1034_v25  ;;  %v836_v10 = vcombine.low %v32_v9, %v32_v9  ;;  %v837_v11 = vcombine.high %v32_v9, %v32_v9 }
  0x1c   :  { %920 = vmatpush3.bf16.msra.mxu0 %v1035_v26 }
  0x1d   :  { %942 = vmatpush3.bf16.msra.mxu1 %v1036_v27  ;;  %921 = vmatprep.subr.bf16.mxu0 %v1037_v28 }
  0x1e   :  { %943 = vmatprep.subr.bf16.mxu1 %v1038_v29 }
  0x20   :  { %922 = vmatpush3.bf16.msra.mxu0 %v1039_v30 }
  0x21   :  { %944 = vmatpush3.bf16.msra.mxu1 %v1040_v31  ;;  %951 = vmatprep.subr.bf16.mxu0 %v1045_v38 }
  0x22   :  { %973 = vmatprep.subr.bf16.mxu1 %v1046_v39 }
  0x23   :  { %606 = vmatmul.mubr.bf16.vlgmr.msra.gmra.mrb[0].mxu0 %v830_v34 }
  0x24   :  { %646 = vmatmul.mubr.bf16.vlgmr.msra.gmra.mrb[0].mxu1 %v832_v36  ;;  %952 = vmatpush3.bf16.msra.mxu0 %v1047_v40 }
  0x25   :  { %974 = vmatpush3.bf16.msra.mxu1 %v1048_v41  ;;  %953 = vmatprep.subr.bf16.mxu0 %v1049_v42 }
  0x26   :  { %975 = vmatprep.subr.bf16.mxu1 %v1050_v43 }
  0x28   :  { %954 = vmatpush3.bf16.msra.mxu0 %v1051_v44 }
  0x29   :  { %976 = vmatpush3.bf16.msra.mxu1 %v1052_v45  ;;  %955 = vmatprep.subr.bf16.mxu0 %v1053_v46 }
  0x2a   :  { %977 = vmatprep.subr.bf16.mxu1 %v1054_v47 }
  0x2c   :  { %956 = vmatpush3.bf16.msra.mxu0 %v1055_v48 }
  0x2d   :  { %978 = vmatpush3.bf16.msra.mxu1 %v1056_v49  ;;  %957 = vmatprep.subr.bf16.mxu0 %v1057_v50 }
  0x2e   :  { %979 = vmatprep.subr.bf16.mxu1 %v1058_v51 }
  0x30   :  { %958 = vmatpush3.bf16.msra.mxu0 %v1059_v52 }
  0x31   :  { %980 = vmatpush3.bf16.msra.mxu1 %v1060_v53  ;;  %959 = vmatprep.subr.bf16.mxu0 %v1061_v54 }
  0x32   :  { %981 = vmatprep.subr.bf16.mxu1 %v1062_v55 }
  0x34   :  { %960 = vmatpush3.bf16.msra.mxu0 %v1063_v56 }
  0x35   :  { %982 = vmatpush3.bf16.msra.mxu1 %v1064_v57  ;;  %961 = vmatprep.subr.bf16.mxu0 %v1065_v58 }
  0x36   :  { %983 = vmatprep.subr.bf16.mxu1 %v1066_v59 }
  0x38   :  { %962 = vmatpush3.bf16.msra.mxu0 %v1067_v60 }
  0x39   :  { %984 = vmatpush3.bf16.msra.mxu1 %v1068_v61  ;;  %963 = vmatprep.subr.bf16.mxu0 %v1069_v62 }
  0x3a   :  { %985 = vmatprep.subr.bf16.mxu1 %v1070_v63 }
  0x3c   :  { %964 = vmatpush3.bf16.msra.mxu0 %v1071_v0 }
  0x3d   :  { %986 = vmatpush3.bf16.msra.mxu1 %v1072_v1  ;;  %965 = vmatprep.subr.bf16.mxu0 %v1073_v2 }
  0x3e   :  { %987 = vmatprep.subr.bf16.mxu1 %v1074_v3 }
  0x40   :  { %966 = vmatpush3.bf16.msra.mxu0 %v1075_v4 }
  0x41   :  { %988 = vmatpush3.bf16.msra.mxu1 %v1076_v5 }
  0x42   :  { %10 = vsyncpa [#allocation4], 0  ;;  %685 = vmatprep.mubr.bf16.mxu0 %v835_v8  ;;  %725 = vmatprep.mubr.bf16.mxu1 %v837_v11  ;;  %vm26_vm0 = vcmask 261120   ;;  %v1107_v12 = vmov 0.0   ;;  %v1081_v13 = vld [vmem:[%s1374_s3] sm:$0xff]   ;;  %vm1108_vm1 = vmmov 0  }
  0x43   :  { %686 = vmatmul.mubr.bf16.vlgmr.msra.gmra.mrb[4].mxu0 %v834_v7  ;;  %27 = vst.msk [vmem:[#allocation2] sm:$0xff] %vm26_vm0, %v1107_v12  ;;  %998 = vmatprep.subr.bf16.mxu0 %v1107_v12  ;;  %v1082_v14 = vld [vmem:[%s1374_s3 + $0x8] sm:$0xff]   ;;  %v902_v40 = vld [vmem:[%s1373_s2] ss:$0 sm:$0xff]  ;;  %s1109_s9 = smov [#allocation3]  }
  0x44   :  { %726 = vmatmul.mubr.bf16.vlgmr.msra.gmra.mrb[4].mxu1 %v836_v10  ;;  %1002 = vmatprep.mubr.msk.bf16.mxu0 %vm1108_vm1, %v1107_v12  ;;  %v903_v44 = vld [vmem:[%s1375_s4] ss:$0 sm:$0xff]  ;;  %s822_s10 = sshll.u32 %s1109_s9, 4  ;;  %s823_s10 = int_to_ptr.vmem [resolvable:$true] %s822_s10 }
  0x45   :  { %999 = vmatpush3.bf16.msra.mxu0 %v1081_v13  ;;  %s1083_s11 = scalar_lea.vmem %s823_s10, 128  ;;  %p1088_p1 = scmp.lt.s32.totalorder %s823_s10, %s823_s10 }
  0x46   :  { %1000 = vmatprep.subr.bf16.mxu0 %v1107_v12  ;;  %p1084_p0 = scmp.ne.s32.totalorder %s823_s10, %s1083_s11  ;;  %p1089_p2 = scmp.lt.s32.totalorder %s1083_s11, %s1083_s11 }
  0x48   :  { %p1090_p3 = por %p1089_p2, %p1088_p1 }
  0x49   :  { %1001 = vmatpush3.bf16.msra.mxu0 %v1082_v14 }
  0x4a   :  { %v28_v37 = vld [vmem:[#allocation2] sm:$0xff]  ;;  %p1091_p4 = pnand %p1090_p3, %p1084_p0 }
  0xf6   :  { %v923_v15 = vpop.f32.mrb[0].mxu0 }
  0xf7   :  { %v945_v16 = vpop.f32.mrb[0].mxu1  ;;  %v924_v17 = vpop.f32.mrb[1].mxu0 }
  0xf8   :  { %v946_v18 = vpop.f32.mrb[1].mxu1  ;;  %v925_v19 = vadd.f32 %v924_v17, %v923_v15  ;;  %v926_v21 = vpop.f32.mrb[2].mxu0 }
  0xf9   :  { %v947_v20 = vadd.f32 %v946_v18, %v945_v16  ;;  %v948_v22 = vpop.f32.mrb[2].mxu1  ;;  %v927_v23 = vpop.f32.mrb[3].mxu0 }
  0xfa   :  { %v949_v24 = vpop.f32.mrb[3].mxu1 }
  0xfb   :  { %v648_v25 = vadd.f32 %v947_v20, %v925_v19 }
 0x116   :  { %v967_v26 = vpop.f32.mrb[4].mxu0 }
 0x117   :  { %v989_v27 = vpop.f32.mrb[4].mxu1  ;;  %v968_v28 = vpop.f32.mrb[5].mxu0 }
 0x118   :  { %v990_v29 = vpop.f32.mrb[5].mxu1  ;;  %v969_v30 = vadd.f32 %v968_v28, %v967_v26  ;;  %v970_v32 = vpop.f32.mrb[6].mxu0 }
 0x119   :  { %v991_v31 = vadd.f32 %v990_v29, %v989_v27  ;;  %v992_v33 = vpop.f32.mrb[6].mxu1  ;;  %v971_v34 = vpop.f32.mrb[7].mxu0 }
 0x11a   :  { %v993_v35 = vpop.f32.mrb[7].mxu1  ;;  %v688_v36 = vadd.f32 %v969_v30, %v648_v25 }
 0x11c   :  { %v728_v38 = vadd.f32 %v991_v31, %v688_v36 }
 0x11e   :  { %v733_v39 = vadd.f32 %v728_v38, %v28_v37 }
 0x120   :  { %735 = vst.msk [vmem:[#allocation2] sm:$0xff] %vm26_vm0, %v733_v39 }
 0x127   :  { %v739_v41 = vld [vmem:[#allocation2] sm:$0xff] }
 0x128   :  { %v747_v42 = vadd.f32 %v902_v40, %v739_v41 }
 0x12a   :  { %v748_v43 = vpack.c.bf16 %v747_v42, %v747_v42 }
 0x12c   :  { %1003 = vmatmul.mubr.msk.bf16.vlgmr.msra.gmra.mrb[8].mxu0 %vm26_vm0, %v748_v43 }
 0x1ff   :  { %v809_v45 = vpop.f32.mrb[8].mxu0 }
 0x200   :  { %v810_v46 = vadd.f32 %v903_v44, %v809_v45  ;;  %v1004_v47 = vpop.f32.mrb[9].mxu0 }
 0x201   :  { %v812_v48 = vpop.f32.mrb[10].mxu0 }
 0x202   :  { %815 = vst [vmem:[#allocation3] sm:$0xff] %v810_v46  ;;  %v1005_v49 = vpop.f32.mrb[11].mxu0 }
 0x203   :  { %1094 = shalt.err (!%p1091_p4)
}
 0x204   :  { %s1095_s4 = scalar_lea.hbm %s1376_s5, 128 }
 0x205   :  { %p1096_p5 = scmp.ne.s32.totalorder %s1376_s5, %s1095_s4  ;;  %p1099_p6 = scmp.lt.u32.totalorder %s1095_s4, %s1376_s5 }
 0x207   :  { %p1101_p7 = pnand %p1099_p6, %p1096_p5 }
 0x209   :  { %1104 = shalt.err (!%p1101_p7)
}
 0x20a   :  { %825 = dma.vmem_to_hbm [thread:$0]  %s823_s10, 128, %s1376_s5, [#allocation4]  }
 0x20b   :  { %1105 = dma.done.wait [#allocation4], 128  }
 0x20c   :  { %1106 = vsyncadd [#allocation4], 4294967168 }
 0x20d   :  { %829 = vsyncpa [#allocation4], 1 }

</bundles_post_ra>
